<compile_context>
chip_gen: v7x
topology: tpu7x:2x2x1
jax: 0.10.0
libtpu: 0.0.40
codegen_flags: <defaults>
</compile_context>

<pallas_src>
import jax
import jax.numpy as jnp
from jax import lax
from jax.experimental import pallas as pl
from jax.experimental.pallas import tpu as pltpu


# ------------------------------ helpers ------------------------------------ #

def _round_up(x, m):
    return ((x + m - 1) // m) * m


def _mish_fast(x):
    # mish(x) = x * tanh(softplus(x)).  tanh(log(1+e^x)) = (p^2-1)/(p^2+1), p=1+e^x.
    # Rewritten with n = e^{-|x|} (no overflow) -> one exp + one approx reciprocal.
    n = jnp.exp(-jnp.abs(x))
    num = jnp.where(x >= 0, 1.0 + 2.0 * n, n * n + 2.0 * n)
    den = num + jnp.where(x >= 0, 2.0 * n * n, 2.0)
    return x * num * pl.reciprocal(den, approx=True)


def _mish_ref(x):
    sp = jnp.maximum(x, 0.0) + jnp.log1p(jnp.exp(-jnp.abs(x)))
    return x * jnp.tanh(sp)


# ----------------- kernel 1: fused relation MLPs (ragged) ------------------- #

def _relation_mlp_kernel(ids_ref, x_ref, w1_ref, b1_ref, w2_ref, b2_ref, out_ref):
    del ids_ref  # only used by the index_maps
    x = x_ref[...]                                           # (TR, S_pad) bf16
    h = jnp.dot(x, w1_ref[0], preferred_element_type=jnp.float32) + b1_ref[0]
    h = _mish_fast(h)
    y = jnp.dot(h.astype(jnp.bfloat16), w2_ref[0],
                preferred_element_type=jnp.float32) + b2_ref[0]
    # residual; padded rows/cols produce garbage that the wrapper slices off
    out_ref[...] = (x.astype(jnp.float32) + y).astype(jnp.bfloat16)


def fused_relation_mlps(tile_rel_ids, x_flat, w1_all, b1_all, w2_all, b2_all,
                        *, row_tile):
    rows_pad, s_pad = x_flat.shape
    num_tiles = rows_pad // row_tile
    gs = pltpu.PrefetchScalarGridSpec(
        num_scalar_prefetch=1,
        grid=(num_tiles,),
        in_specs=[
            pl.BlockSpec((row_tile, s_pad), lambda t, ids: (t, 0)),
            pl.BlockSpec((1, s_pad, s_pad), lambda t, ids: (ids[t], 0, 0)),
            pl.BlockSpec((1, 1, s_pad),     lambda t, ids: (ids[t], 0, 0)),
            pl.BlockSpec((1, s_pad, s_pad), lambda t, ids: (ids[t], 0, 0)),
            pl.BlockSpec((1, 1, s_pad),     lambda t, ids: (ids[t], 0, 0)),
        ],
        out_specs=pl.BlockSpec((row_tile, s_pad), lambda t, ids: (t, 0)),
    )
    return pl.pallas_call(
        _relation_mlp_kernel,
        out_shape=jax.ShapeDtypeStruct((rows_pad, s_pad), jnp.bfloat16),
        grid_spec=gs,
        compiler_params=pltpu.CompilerParams(
            dimension_semantics=("parallel",),
            vmem_limit_bytes=32 * 1024 * 1024),
    )(tile_rel_ids, x_flat, w1_all, b1_all, w2_all, b2_all)


# --------------- kernel 2: fused scatter-add + update MLP ------------------- #

def _scatter_update_kernel(idx_ref, msg_ref, node_ref, w1m_ref, w1n_ref, b1_ref,
                           w2_ref, b2_ref, out_ref, acc_ref):
    m = pl.program_id(1)

    @pl.when(m == 0)
    def _():
        acc_ref[...] = jnp.zeros_like(acc_ref)

    tn = acc_ref.shape[0]
    tm = idx_ref.shape[1]
    # local destination ids; -1 padding / out-of-tile ids never match [0, tn)
    local_ids = idx_ref[...] - pl.program_id(0) * tn                 # (1, tm) int32
    onehot = (lax.broadcasted_iota(jnp.int32, (tn, tm), 0)
              == local_ids).astype(jnp.bfloat16)
    acc_ref[...] += jnp.dot(onehot, msg_ref[...],                    # msgs already bf16
                            preferred_element_type=jnp.float32)

    @pl.when(m == pl.num_programs(1) - 1)
    def _():
        h = (jnp.dot(acc_ref[...].astype(jnp.bfloat16), w1m_ref[...],
                     preferred_element_type=jnp.float32)
             + jnp.dot(node_ref[...].astype(jnp.bfloat16), w1n_ref[...],
                       preferred_element_type=jnp.float32)
             + b1_ref[...])
        h = _mish_fast(h)
        # lane-dense (node_tile, 128) store; padded output cols are exact zeros
        out_ref[...] = (jnp.dot(h.astype(jnp.bfloat16), w2_ref[...],
                                preferred_element_type=jnp.float32) + b2_ref[...])


def fused_scatter_update(indices, messages, node_embeddings,
                         w1_msg, w1_node, b1, w2, b2, *, node_tile, msg_tile):
    n_pad, e = node_embeddings.shape
    m_pad = indices.shape[1]
    e_out = w2.shape[1]
    grid = (n_pad // node_tile, m_pad // msg_tile)
    gs = pltpu.PrefetchScalarGridSpec(
        num_scalar_prefetch=0,
        grid=grid,
        in_specs=[
            pl.BlockSpec((1, msg_tile),        lambda n, m: (0, m)),
            pl.BlockSpec((msg_tile, e),        lambda n, m: (m, 0)),
            pl.BlockSpec((node_tile, e),       lambda n, m: (n, 0)),
            pl.BlockSpec(w1_msg.shape,         lambda n, m: (0, 0)),
            pl.BlockSpec(w1_node.shape,        lambda n, m: (0, 0)),
            pl.BlockSpec(b1.shape,             lambda n, m: (0, 0)),
            pl.BlockSpec(w2.shape,             lambda n, m: (0, 0)),
            pl.BlockSpec(b2.shape,             lambda n, m: (0, 0)),
        ],
        out_specs=pl.BlockSpec((node_tile, e_out), lambda n, m: (n, 0)),
        scratch_shapes=[pltpu.VMEM((node_tile, e), jnp.float32)],
    )
    return pl.pallas_call(
        _scatter_update_kernel,
        out_shape=jax.ShapeDtypeStruct((n_pad, e_out), jnp.float32),
        grid_spec=gs,
        compiler_params=pltpu.CompilerParams(
            dimension_semantics=("parallel", "arbitrary"),
            vmem_limit_bytes=32 * 1024 * 1024),
    )(indices, messages, node_embeddings, w1_msg, w1_node, b1, w2, b2)


# --------------------------- parameter setup -------------------------------- #

def _init_linear(key, in_dim, out_dim):
    k_w, k_b = jax.random.split(key)
    bound = 1.0 / (in_dim ** 0.5)
    w = jax.random.uniform(k_w, (in_dim, out_dim), jnp.float32, -bound, bound)
    b = jax.random.uniform(k_b, (1, out_dim), jnp.float32, -bound, bound)
    return w, b


def _init_mlp(key, in_dim, out_dim):
    k1, k2 = jax.random.split(key)
    w1, b1 = _init_linear(k1, in_dim, in_dim)
    w2, b2 = _init_linear(k2, in_dim, out_dim)
    return {"w1": w1, "b1": b1, "w2": w2, "b2": b2}


class SumRelationMessagePassing:
    def __init__(self, predicate_signatures, embedding_size, key):
        predicate_signatures = sorted(predicate_signatures)
        self.embedding_size = embedding_size
        self.relation_arity = {}
        self.relation_params = {}                      # f32 masters (reference)
        keys = jax.random.split(key, len(predicate_signatures) + 1)
        for k, (name, arity) in zip(keys[:-1], predicate_signatures):
            size = arity * embedding_size
            if size > 0:
                self.relation_arity[name] = arity
                self.relation_params[name] = _init_mlp(k, size, size)
        self.update_params = _init_mlp(keys[-1], 2 * embedding_size, embedding_size)

        # ---- pre-packed kernel parameters ----
        e = embedding_size
        self.relation_names = list(self.relation_params.keys())
        self.relation_index = {n: i for i, n in enumerate(self.relation_names)}
        max_arity = max(self.relation_arity.values()) if self.relation_arity else 1
        # lane-dense padded relation feature width (multiple of 128)
        self.s_pad = _round_up(max(max_arity * e, 1), 128)

        w1s, b1s, w2s, b2s = [], [], [], []
        for name in self.relation_names:
            p = self.relation_params[name]
            s = self.relation_arity[name] * e
            w1 = jnp.zeros((self.s_pad, self.s_pad), jnp.float32).at[:s, :s].set(p["w1"])
            w2 = jnp.zeros((self.s_pad, self.s_pad), jnp.float32).at[:s, :s].set(p["w2"])
            b1 = jnp.zeros((1, self.s_pad), jnp.float32).at[:, :s].set(p["b1"])
            b2 = jnp.zeros((1, self.s_pad), jnp.float32).at[:, :s].set(p["b2"])
            w1s.append(w1.astype(jnp.bfloat16))
            w2s.append(w2.astype(jnp.bfloat16))
            b1s.append(b1)
            b2s.append(b2)
        if self.relation_names:
            self.rel_w1 = jnp.stack(w1s)   # (R, S_pad, S_pad) bf16
            self.rel_b1 = jnp.stack(b1s)   # (R, 1, S_pad)     f32
            self.rel_w2 = jnp.stack(w2s)
            self.rel_b2 = jnp.stack(b2s)

        up = self.update_params
        # split update W1 so the (sum_msg, node) concat never materializes;
        # zero-pad W2/b2 output dim to 128 lanes for an unmasked (lane-dense) store
        self.e_out_pad = _round_up(e, 128)
        self.upd_w1_msg = up["w1"][:e, :].astype(jnp.bfloat16)    # (E, 2E)
        self.upd_w1_node = up["w1"][e:, :].astype(jnp.bfloat16)   # (E, 2E)
        self.upd_b1 = up["b1"]                                    # (1, 2E) f32
        self.upd_w2 = (jnp.zeros((2 * e, self.e_out_pad), jnp.float32)
                       .at[:, :e].set(up["w2"]).astype(jnp.bfloat16))   # (2E, 128)
        self.upd_b2 = (jnp.zeros((1, self.e_out_pad), jnp.float32)
                       .at[:, :e].set(up["b2"]))                        # (1, 128) f32

    def __call__(self, node_embeddings, atoms):
        e = self.embedding_size
        num_nodes = node_embeddings.shape[0]

        present = [n for n in self.relation_names
                   if n in atoms and atoms[n].shape[0] > 0]

        msgs, idxs = [], []
        if present:
            counts, gathered = [], []
            for name in present:
                av = atoms[name]
                arity = self.relation_arity[name]
                n_r = av.shape[0] // arity
                counts.append(n_r)
                # torch.index_select gather kept as JAX glue (see TODO at top);
                # built directly in bf16 so kernel 1 reads/writes bf16 activations
                gathered.append(node_embeddings[av]
                                .reshape(n_r, arity * e).astype(jnp.bfloat16))

            # flat ragged layout: each relation padded only to a multiple of row_tile
            row_tile = min(512, _round_up(max(counts), 8))
            pieces, tile_ids, offsets = [], [], []
            off = 0
            for name, g, n_r in zip(present, gathered, counts):
                n_r_pad = _round_up(n_r, row_tile)
                pieces.append(jnp.pad(
                    g, ((0, n_r_pad - n_r), (0, self.s_pad - g.shape[1]))))
                tile_ids += [self.relation_index[name]] * (n_r_pad // row_tile)
                offsets.append(off)
                off += n_r_pad

            x_flat = jnp.concatenate(pieces, axis=0)       # (rows_pad, S_pad) bf16
            tile_rel_ids = jnp.array(tile_ids, jnp.int32)  # per-tile relation id

            y = fused_relation_mlps(tile_rel_ids, x_flat,
                                    self.rel_w1, self.rel_b1,
                                    self.rel_w2, self.rel_b2,
                                    row_tile=row_tile)

            for name, n_r, off_r in zip(present, counts, offsets):
                arity = self.relation_arity[name]
                out = y[off_r:off_r + n_r, :arity * e].reshape(n_r * arity, e)
                msgs.append(out)
                idxs.append(atoms[name].astype(jnp.int32))

        if msgs:
            messages = jnp.concatenate(msgs, axis=0)       # (M, E) bf16
            indices = jnp.concatenate(idxs, axis=0)
        else:  # no relation present in `atoms` -> sum_msg is all zeros
            messages = jnp.zeros((0, e), jnp.bfloat16)
            indices = jnp.zeros((0,), jnp.int32)

        m = messages.shape[0]
        m_pad0 = _round_up(max(m, 1), 128)
        msg_tile = min(m_pad0, 256)
        m_pad = _round_up(m_pad0, msg_tile)
        messages = jnp.pad(messages, ((0, m_pad - m), (0, 0)))
        indices = jnp.concatenate(
            [indices, jnp.full((m_pad - m,), -1, jnp.int32)]).reshape(1, m_pad)

        node_tile = min(512, _round_up(num_nodes, 8))
        # v7x: give both TensorCores work on the "parallel" node axis when possible
        if node_tile > 8 and _round_up(num_nodes, node_tile) == node_tile:
            node_tile = _round_up((node_tile + 1) // 2, 8)
        n_pad = _round_up(num_nodes, node_tile)
        node_p = jnp.pad(node_embeddings, ((0, n_pad - num_nodes), (0, 0)))

        out = fused_scatter_update(indices, messages, node_p,
                                   self.upd_w1_msg, self.upd_w1_node, self.upd_b1,
                                   self.upd_w2, self.upd_b2,
                                   node_tile=node_tile, msg_tile=msg_tile)
        return out[:num_nodes, :e]


# ------------------------------ reference ----------------------------------- #

def reference_forward(model, node_embeddings, atoms):
    e = model.embedding_size

    def mlp(p, x):
        h = _mish_ref(x @ p["w1"] + p["b1"])
        return h @ p["w2"] + p["b2"]

    sum_msg = jnp.zeros_like(node_embeddings)
    for name, p in model.relation_params.items():
        if name in atoms:
            av = atoms[name]
            arity = model.relation_arity[name]
            x = node_embeddings[av].reshape(-1, arity * e)
            out = (x + mlp(p, x)).reshape(-1, e)
            sum_msg = sum_msg.at[av].add(out)
    upd_in = jnp.concatenate([sum_msg, node_embeddings], axis=1)
    return mlp(model.update_params, upd_in)


# -------------------------------- main --------------------------------------- #

if __name__ == "__main__":
    key = jax.random.PRNGKey(0)
    k_emb, k_model = jax.random.split(key)

    embedding_size = 32
    num_nodes = 8
    predicate_signatures = [("on", 2), ("clear", 1), ("at", 2)]

    model = SumRelationMessagePassing(predicate_signatures, embedding_size, k_model)

    node_embeddings = jax.random.normal(
        k_emb, (num_nodes, embedding_size), jnp.float32)
    atoms = {
        "on":    jnp.array([0, 1, 2, 3, 1, 4], dtype=jnp.int32),  # 3 atoms, arity 2 (flattened)
        "clear": jnp.array([4, 5, 0], dtype=jnp.int32),           # 3 atoms, arity 1
        "at":    jnp.array([6, 7], dtype=jnp.int32),              # 1 atom,  arity 2
    }

    out = model(node_embeddings, atoms)
    out = jax.block_until_ready(out)

    ref = reference_forward(model, node_embeddings, atoms)
    assert out.shape == (num_nodes, embedding_size)
    # bf16-stored activations, bf16 MXU inputs (f32 accumulation) and
    # approx-reciprocal mish -> small drift vs the f32 reference.
    err = float(jnp.max(jnp.abs(out - ref)))
    assert jnp.allclose(out, ref, atol=5e-2, rtol=5e-2), err

    print("KERNEL_OK")
</pallas_src>

<mosaic_0001>
module attributes {stable_mosaic.version = 11 : i64} {
  func.func @_relation_mlp_kernel(%arg0: i32, %arg1: memref<3xi32, #tpu.memory_space<smem>>, %arg2: memref<8x128xbf16, #tpu.memory_space<vmem>>, %arg3: memref<1x128x128xbf16, #tpu.memory_space<vmem>>, %arg4: memref<1x1x128xf32, #tpu.memory_space<vmem>>, %arg5: memref<1x128x128xbf16, #tpu.memory_space<vmem>>, %arg6: memref<1x1x128xf32, #tpu.memory_space<vmem>>, %arg7: memref<8x128xbf16, #tpu.memory_space<vmem>>) attributes {dimension_semantics = [#tpu.dimension_semantics<parallel>], iteration_bounds = array<i64: 3>, scalar_prefetch = 1 : i64, scratch_operands = 0 : i64, tpu.core_type = #tpu.core_type<tc>, window_params = [{transform_indices = @transform_0, window_bounds = array<i64: 8, 128>}, {transform_indices = @transform_1, window_bounds = array<i64: 1, 128, 128>}, {transform_indices = @transform_2, window_bounds = array<i64: 1, 1, 128>}, {transform_indices = @transform_3, window_bounds = array<i64: 1, 128, 128>}, {transform_indices = @transform_4, window_bounds = array<i64: 1, 1, 128>}, {transform_indices = @transform_5, window_bounds = array<i64: 8, 128>}]} {
    %c0 = arith.constant 0 : index
    %c0_0 = arith.constant 0 : index
    %0 = vector.load %arg2[%c0, %c0_0] : memref<8x128xbf16, #tpu.memory_space<vmem>>, vector<8x128xbf16>
    %c0_1 = arith.constant 0 : index
    %c0_2 = arith.constant 0 : index
    %c0_3 = arith.constant 0 : index
    %1 = vector.load %arg3[%c0_1, %c0_2, %c0_3] : memref<1x128x128xbf16, #tpu.memory_space<vmem>>, vector<1x128x128xbf16>
    %2 = vector.shape_cast %1 : vector<1x128x128xbf16> to vector<128x128xbf16>
    %cst = arith.constant dense<0.000000e+00> : vector<8x128xf32>
    %3 = tpu.matmul %0, %2, %cst {dimension_numbers = #tpu.dot_dimension_numbers<[1], [0], [0], [1], [0, 0, 1, 1], [], []>} : vector<8x128xbf16>, vector<128x128xbf16>, vector<8x128xf32> -> vector<8x128xf32>
    %c0_4 = arith.constant 0 : index
    %c0_5 = arith.constant 0 : index
    %c0_6 = arith.constant 0 : index
    %4 = vector.load %arg4[%c0_4, %c0_5, %c0_6] : memref<1x1x128xf32, #tpu.memory_space<vmem>>, vector<1x1x128xf32>
    %5 = vector.shape_cast %4 : vector<1x1x128xf32> to vector<1x128xf32>
    %6 = vector.broadcast %5 : vector<1x128xf32> to vector<8x128xf32>
    %7 = arith.addf %3, %6 : vector<8x128xf32>
    %8 = math.absf %7 : vector<8x128xf32>
    %cst_7 = arith.constant 0.000000e+00 : f32
    %9 = vector.broadcast %cst_7 : f32 to vector<8x128xf32>
    %10 = arith.subf %9, %8 : vector<8x128xf32>
    %11 = math.exp %10 : vector<8x128xf32>
    %cst_8 = arith.constant 0.000000e+00 : f32
    %12 = vector.broadcast %cst_8 : f32 to vector<8x128xf32>
    %13 = arith.cmpf oge, %7, %12 : vector<8x128xf32>
    %cst_9 = arith.constant 2.000000e+00 : f32
    %14 = vector.broadcast %cst_9 : f32 to vector<8x128xf32>
    %15 = arith.mulf %14, %11 : vector<8x128xf32>
    %cst_10 = arith.constant 1.000000e+00 : f32
    %16 = vector.broadcast %cst_10 : f32 to vector<8x128xf32>
    %17 = arith.addf %16, %15 : vector<8x128xf32>
    %18 = arith.mulf %11, %11 : vector<8x128xf32>
    %cst_11 = arith.constant 2.000000e+00 : f32
    %19 = vector.broadcast %cst_11 : f32 to vector<8x128xf32>
    %20 = arith.mulf %19, %11 : vector<8x128xf32>
    %21 = arith.addf %18, %20 : vector<8x128xf32>
    %22 = arith.select %13, %17, %21 : vector<8x128xi1>, vector<8x128xf32>
    %cst_12 = arith.constant 0.000000e+00 : f32
    %23 = vector.broadcast %cst_12 : f32 to vector<8x128xf32>
    %24 = arith.cmpf oge, %7, %23 : vector<8x128xf32>
    %cst_13 = arith.constant 2.000000e+00 : f32
    %25 = vector.broadcast %cst_13 : f32 to vector<8x128xf32>
    %26 = arith.mulf %25, %11 : vector<8x128xf32>
    %27 = arith.mulf %26, %11 : vector<8x128xf32>
    %cst_14 = arith.constant 2.000000e+00 : f32
    %28 = vector.broadcast %cst_14 : f32 to vector<8x128xf32>
    %29 = arith.select %24, %27, %28 : vector<8x128xi1>, vector<8x128xf32>
    %30 = arith.addf %22, %29 : vector<8x128xf32>
    %31 = arith.mulf %7, %22 : vector<8x128xf32>
    %32 = tpu.reciprocal %30 {approx = true} : vector<8x128xf32> -> vector<8x128xf32>
    %33 = arith.mulf %31, %32 : vector<8x128xf32>
    %34 = arith.truncf %33 : vector<8x128xf32> to vector<8x128xbf16>
    %c0_15 = arith.constant 0 : index
    %c0_16 = arith.constant 0 : index
    %c0_17 = arith.constant 0 : index
    %35 = vector.load %arg5[%c0_15, %c0_16, %c0_17] : memref<1x128x128xbf16, #tpu.memory_space<vmem>>, vector<1x128x128xbf16>
    %36 = vector.shape_cast %35 : vector<1x128x128xbf16> to vector<128x128xbf16>
    %cst_18 = arith.constant dense<0.000000e+00> : vector<8x128xf32>
    %37 = tpu.matmul %34, %36, %cst_18 {dimension_numbers = #tpu.dot_dimension_numbers<[1], [0], [0], [1], [0, 0, 1, 1], [], []>} : vector<8x128xbf16>, vector<128x128xbf16>, vector<8x128xf32> -> vector<8x128xf32>
    %c0_19 = arith.constant 0 : index
    %c0_20 = arith.constant 0 : index
    %c0_21 = arith.constant 0 : index
    %38 = vector.load %arg6[%c0_19, %c0_20, %c0_21] : memref<1x1x128xf32, #tpu.memory_space<vmem>>, vector<1x1x128xf32>
    %39 = vector.shape_cast %38 : vector<1x1x128xf32> to vector<1x128xf32>
    %40 = vector.broadcast %39 : vector<1x128xf32> to vector<8x128xf32>
    %41 = arith.addf %37, %40 : vector<8x128xf32>
    %42 = arith.extf %0 : vector<8x128xbf16> to vector<8x128xf32>
    %43 = arith.addf %42, %41 : vector<8x128xf32>
    %44 = arith.truncf %43 : vector<8x128xf32> to vector<8x128xbf16>
    %c0_22 = arith.constant 0 : index
    %c0_23 = arith.constant 0 : index
    %45 = vector.load %arg7[%c0_22, %c0_23] : memref<8x128xbf16, #tpu.memory_space<vmem>>, vector<8x128xbf16>
    tpu.vector_store %arg7[%c0_22, %c0_23], %44 {strides = array<i32>} : memref<8x128xbf16, #tpu.memory_space<vmem>>, vector<8x128xbf16>,
    return
  }
  func.func @transform_0(%arg0: i32, %arg1: memref<3xi32, #tpu.memory_space<smem>>) -> (i32, i32) {
    %c0_i32 = arith.constant 0 : i32
    %c0_i32_0 = arith.constant 0 : i32
    return %arg0, %c0_i32 : i32, i32
  }
  func.func @transform_1(%arg0: i32, %arg1: memref<3xi32, #tpu.memory_space<smem>>) -> (i32, i32, i32) {
    %0 = arith.index_cast %arg0 : i32 to index
    %1 = memref.load %arg1[%0] : memref<3xi32, #tpu.memory_space<smem>>
    %c0_i32 = arith.constant 0 : i32
    %c0_i32_0 = arith.constant 0 : i32
    %c0_i32_1 = arith.constant 0 : i32
    return %1, %c0_i32, %c0_i32_0 : i32, i32, i32
  }
  func.func @transform_2(%arg0: i32, %arg1: memref<3xi32, #tpu.memory_space<smem>>) -> (i32, i32, i32) {
    %0 = arith.index_cast %arg0 : i32 to index
    %1 = memref.load %arg1[%0] : memref<3xi32, #tpu.memory_space<smem>>
    %c0_i32 = arith.constant 0 : i32
    %c0_i32_0 = arith.constant 0 : i32
    %c0_i32_1 = arith.constant 0 : i32
    return %1, %c0_i32, %c0_i32_0 : i32, i32, i32
  }
  func.func @transform_3(%arg0: i32, %arg1: memref<3xi32, #tpu.memory_space<smem>>) -> (i32, i32, i32) {
    %0 = arith.index_cast %arg0 : i32 to index
    %1 = memref.load %arg1[%0] : memref<3xi32, #tpu.memory_space<smem>>
    %c0_i32 = arith.constant 0 : i32
    %c0_i32_0 = arith.constant 0 : i32
    %c0_i32_1 = arith.constant 0 : i32
    return %1, %c0_i32, %c0_i32_0 : i32, i32, i32
  }
  func.func @transform_4(%arg0: i32, %arg1: memref<3xi32, #tpu.memory_space<smem>>) -> (i32, i32, i32) {
    %0 = arith.index_cast %arg0 : i32 to index
    %1 = memref.load %arg1[%0] : memref<3xi32, #tpu.memory_space<smem>>
    %c0_i32 = arith.constant 0 : i32
    %c0_i32_0 = arith.constant 0 : i32
    %c0_i32_1 = arith.constant 0 : i32
    return %1, %c0_i32, %c0_i32_0 : i32, i32, i32
  }
  func.func @transform_5(%arg0: i32, %arg1: memref<3xi32, #tpu.memory_space<smem>>) -> (i32, i32) {
    %c0_i32 = arith.constant 0 : i32
    %c0_i32_0 = arith.constant 0 : i32
    return %arg0, %c0_i32 : i32, i32
  }
}

</mosaic_0001>

<bundles_post_ra>
// kernel: tpu_custom_call.1
= control target key start
LH: loop header
LB: loop body
LE: loop exit
PB: predicated region body
PF: predicated region fallthrough
CT: control target
= control target key end

     0   :  { %s1692_s0 = inlined_call_operand.hbm [shape: s32[3], index: 0, kind: input, shape index: {}]   ;;  %s1693_s1 = inlined_call_operand.hbm [shape: bf16[24,128], index: 1, kind: input, shape index: {}]   ;;  %s1694_s2 = inlined_call_operand.hbm [shape: bf16[3,128,128], index: 2, kind: input, shape index: {}]   ;;  %s1695_s3 = inlined_call_operand.vmem [shape: f32[3,1,128], index: 3, kind: input, shape index: {}]   ;;  %s1696_s4 = inlined_call_operand.hbm [shape: bf16[3,128,128], index: 4, kind: input, shape index: {}]   ;;  %s1697_s5 = inlined_call_operand.vmem [shape: f32[3,1,128], index: 5, kind: input, shape index: {}]   ;;  %s1698_s6 = inlined_call_operand.hbm [shape: bf16[24,128], index: 6, kind: output, shape index: {}]  }
   0x1   :  { %1710 = sst [smem:[#allocation25_spill]] %s1693_s1  ;;  %s997_s23 = scalar_lea.hbm %s1692_s0, 16 }
   0x2   :  { %1711 = sst [smem:[#allocation26_spill]] %s1694_s2  ;;  %p998_p0 = scmp.ne.s32.totalorder %s1692_s0, %s997_s23 }
   0x3   :  { %p1001_p1 = scmp.lt.u32.totalorder %s997_s23, %s1692_s0 }
   0x5   :  { %p1003_p2 = pnand %p1001_p1, %p998_p0 }
   0x7   :  { %1006 = shalt.err (!%p1003_p2)  }
   0x8   :  { %s1223_s28 = smov [#allocation3]  }
   0x9   :  { %12 = dma.hbm_to_smem %s1692_s0, 16, %s1223_s28, [#allocation2] }
   0xa   :  { %1165 = dma.done.wait [#allocation2], 16 }
   0xb   :  { %1166 = vsyncadd [#allocation2], 4294967280 }
   0xc   :  { %14 = sfence }
   0xd   :  { %15 = vsyncpa [#allocation5], 0 }
   0xe   :  { %17 = vsyncpa [#allocation5 + $0x1], 0 }
   0xf   :  { %18 = vsyncpa [#allocation8], 0 }
  0x10   :  { %20 = vsyncpa [#allocation8 + $0x1], 0 }
  0x11   :  { %21 = vsyncpa [#allocation6], 0 }
  0x12   :  { %23 = vsyncpa [#allocation6 + $0x1], 0  ;;  %s1279_s7 = smov 0   ;;  %s1281_s8 = smov 0  }
  0x13   :  { %s1283_s9 = smov 0   ;;  %s1285_s10 = smov 0  }
  0x14   :  { %s1287_s11 = smov 0   ;;  %s1289_s0 = smov 0  }
  0x15   :  { %s1291_s12 = smov 0   ;;  %s1293_s13 = smov 0  }
  0x16   :  { %s1295_s14 = smov 0   ;;  %s1297_s15 = smov 0  }
  0x17 LB: > { %1712 = sst [smem:[#allocation20_spill]] %s1205_s0  ;;  %s1330_s16 = sadd.s32 1, %s1221_s15   ;;  %s1221_s15 = sphi %s1297_s15, %s1757_s15   ;;  %s1217_s14 = sphi %s1295_s14, %s1749_s14   ;;  %s1213_s13 = sphi %s1293_s13, %s1756_s13   ;;  %s1209_s12 = sphi %s1291_s12, %s1755_s12   ;;  %s1205_s0 = sphi %s1289_s0, %s1747_s0   ;;  %s1201_s11 = sphi %s1287_s11, %s1754_s11   ;;  %s1197_s10 = sphi %s1285_s10, %s1753_s10   ;;  %s1193_s9 = sphi %s1283_s9, %s1752_s9   ;;  %s1189_s8 = sphi %s1281_s8, %s1751_s8   ;;  %s1185_s7 = sphi %s1279_s7, %s1750_s7  }
  0x18   : > { %1713 = sst [smem:[#allocation21_spill]] %s1217_s14  ;;  %p1700_p3 = scmp.eq.s32.totalorder %s1221_s15, 0 }
  0x19   : > { %s59_s17 = sld [smem:[#allocation3 + %s1221_s15]]  ;;  %s64_s19 = sadd.s32 1, %s1205_s0 }
  0x1a   : > { %s60_s18 = sld [smem:[#allocation3 + %s1330_s16]]  ;;  %p71_p4 = scmp.ne.s32.totalorder %s1205_s0, %s1201_s11 }
  0x1b   : > { %p1699_p7 = scmp.lt.s32.totalorder %s1221_s15, 3  ;;  %s229_s21 = sand.u32 1, %s1221_s15  }
  0x1c   : > { %p1342_p6 = por %p71_p4, %p1700_p3  ;;  %s231_s22 = sand.u32 1, %s1205_s0  }
  0x1d   : > { %s767_s23 = sshll.u32 %s231_s22, 6  ;;  %p773_p10 = scmp.ge.s32.totalorder %s1221_s15, 1 }
  0x1e   : > { %s233_s25 = scalar_lea.vmem [#allocation7], %s767_s23  ;;  %p1367_p9 = pnand %p1699_p7, %p1342_p6 }
  0x1f   : > { %s241_s26 = sshll.u32 %s233_s25, 4  ;;  %p287_p11 = scmp.lt.s32.totalorder %s1221_s15, 4  ;;  %s1361_s26 = int_to_ptr.vmem [resolvable:$true] %s241_s26 }
  0x20   : > { %s61_s24 = ssub.s32 %s59_s17, %s60_s18  ;;  %s1718_s2 = sld [smem:[#allocation26_spill]] }
  0x21   : > { %p62_p8 = scmp.eq.s32.totalorder %s61_s24, 0  ;;  %p1373_p12 = pnand %p773_p10, %p287_p11 }
  0x22   : > { %s861_s27 = scalar_select %p1342_p6, [#allocation3], [#allocation11] }
  0x23   : > { %s1352_s28 = scalar_select %p62_p8, %s1205_s0, %s64_s19  }
  0x24   : > { %s862_s29 = scalar_select %p1342_p6, %s1221_s15, 0 }
  0x25   : > { %1715 = sst [smem:[#allocation22_spill]] %s1352_s28  ;;  %s1759_s27 = smov (!%p1699_p7, %s861_s27), [#allocation13] }
  0x26   : > { %s1761_s29 = smov (!%p1699_p7, %s862_s29), 0  ;;  %s1383_s20 = sadd.s32 4294967295, %s1221_s15  }
  0x27   : > { %s234_s17 = sld [smem:[%s1759_s27 + %s1761_s29]]  ;;  %s1385_s25 = scalar_lea.sflag [#allocation8], %s229_s21 }
  0x28   : > { %p1009_p0 = pneg %p1367_p9 }
  0x2d   : > { %s800_s19 = sshll.u32 %s234_s17, 10 }
  0x2e   : > { %s1380_s24 = scalar_lea.hbm %s1718_s2, %s800_s19  ;;  %s1012_s19 = scalar_lea.hbm %s1718_s2, 3072 }
  0x2f   : > { %s1007_s27 = scalar_lea.hbm %s1380_s24, 1024  ;;  %p1013_p4 = scmp.lt.u32.totalorder %s1380_s24, %s1718_s2 }
  0x30   : > { %p1008_p13 = scmp.ne.s32.totalorder %s1380_s24, %s1007_s27  ;;  %p1014_p6 = scmp.lt.u32.totalorder %s1012_s19, %s1007_s27 }
  0x31   : > { %p1016_p10 = scmp.lt.u32.totalorder %s1007_s27, %s1380_s24 }
  0x32   : > { %p1010_p1 = pnand %p1009_p0, %p1008_p13  ;;  %p1015_p8 = por %p1014_p6, %p1013_p4 }
  0x34   : > { %p1011_p2 = pneg %p1010_p1  ;;  %p1017_p11 = por %p1016_p10, %p1015_p8 }
  0x36   : > { %p1018_p7 = pnand %p1017_p11, %p1011_p2 }
  0x38   : > { %1021 = shalt.err (!%p1018_p7)
}
  0x39   : > { %s1022_s21 = scalar_lea.vmem %s1361_s26, 1024  ;;  %s1224_s29 = smov [#allocation7]  }
  0x3a   : > { %p1023_p13 = scmp.ne.s32.totalorder %s1361_s26, %s1022_s21  ;;  %s1027_s17 = sshll.u32 %s1224_s29, 4  ;;  %s1028_s17 = int_to_ptr.vmem [resolvable:$false] %s1027_s17 }
  0x3b   : > { %s1029_s22 = scalar_lea.vmem %s1028_s17, 2048  ;;  %p1030_p3 = scmp.lt.s32.totalorder %s1361_s26, %s1028_s17 }
  0x3c   : > { %p1025_p1 = pnand %p1023_p13, %p1009_p0  ;;  %p1031_p4 = scmp.lt.s32.totalorder %s1029_s22, %s1022_s21 }
  0x3e   : > { %p1026_p5 = pneg %p1025_p1  ;;  %p1032_p6 = por %p1031_p4, %p1030_p3 }
  0x40   : > { %p1033_p8 = pnand %p1032_p6, %p1026_p5 }
  0x42   : > { %1036 = shalt.err (!%p1033_p8)
}
  0x43   : > { %s1701_s27 = smov 64   ;;  %s1702_s19 = smov 4  }
  0x44   : > { %880 = dma.hbm_to_vmem [thread:$0]  (!%p1367_p9), %s1380_s24, 1024, %s1361_s26, %s1385_s25, %s1701_s27, %s1701_s27, %s1702_s19  }
  0x45   : > { %s762_s23 = sadd.s32 4294967294, %s1221_s15   ;;  %s33_s21 = ssub.s32 %s1221_s15, %s1330_s16 }
  0x46   : > { %p34_p3 = scmp.eq.s32.totalorder %s33_s21, 0  ;;  %s36_s29 = sadd.s32 1, %s1217_s14 }
  0x47   : > { %p43_p5 = scmp.ne.s32.totalorder %s1217_s14, %s1213_s13  ;;  %p49_p7 = scmp.ne.s32.totalorder %s1213_s13, %s1209_s12 }
  0x48   : > { %s1425_s17 = scalar_select %p34_p3, %s1217_s14, %s36_s29  }
  0x49   : > { %p1720_p0 = scmp.eq.s32.totalorder %s1221_s15, 0  ;;  %p1705_p10 = scmp.eq.s32.totalorder %s1383_s20, 0 }
  0x4a   : > { %1719 = sst [smem:[#allocation23_spill]] %s1425_s17  ;;  %p185_p11 = scmp.eq.s32.totalorder %s1383_s20, 2 }
  0x4b   : > { %p1429_p2 = por %p1720_p0, %p43_p5  ;;  %p191_p9 = scmp.eq.s32.totalorder %s762_s23, 2 }
  0x4c   : > { %p1437_p13 = por %p1705_p10, %p49_p7  ;;  %p1723_p1 = scmp.ne.s32.totalorder %s1201_s11, %s1197_s10 }
  0x4d   : > { %p1450_p6 = por %p185_p11, %p43_p5  ;;  %p1454_p8 = por %p191_p9, %p49_p7 }
  0x4e   : > { %s1722_s26 = scalar_select %p1437_p13, 1, 0 }
  0x4f   : > { %p1446_p4 = por %p1723_p1, %p1705_p10  ;;  %s211_s23 = sand.u32 1, %s1217_s14  }
  0x50   : > { %s1725_s24 = scalar_select %p1450_p6, 1, 0 }
  0x51   : > { %s1724_s30 = scalar_select %p1446_p4, 1, 0 }
  0x52   : > { %s1726_s21 = scalar_select %p1454_p8, 1, 0 }
  0x53   : > { %s766_s29 = sshll.u32 %s1221_s15, 6  ;;  %s765_s27 = sshll.u32 %s211_s23, 2 }
  0x54   : > { %s1727_s1 = sld [smem:[#allocation25_spill]]  ;;  %s215_s10 = scalar_lea.vmem [#allocation4], %s765_s27 }
  0x55   : > { %s222_s28 = sshll.u32 %s215_s10, 4  ;;  %p1728_p3 = scmp.lt.s32.totalorder %s1221_s15, 3  ;;  %s1473_s28 = int_to_ptr.vmem [resolvable:$true] %s222_s28 }
  0x56   : > { %s212_s14 = scalar_lea.sflag [#allocation5], %s211_s23 }
  0x57   : > { %p1469_p5 = pnand %p1728_p3, %p1429_p2 }
  0x59   : > { %p1039_p0 = pneg %p1469_p5 }
  0x5a   : > { %s1463_s17 = scalar_lea.hbm %s1727_s1, %s766_s29  ;;  %s1042_s22 = scalar_lea.hbm %s1727_s1, 192 }
  0x5b   : > { %s1037_s2 = scalar_lea.hbm %s1463_s17, 64  ;;  %p1043_p2 = scmp.lt.u32.totalorder %s1463_s17, %s1727_s1 }
  0x5c   : > { %p1038_p7 = scmp.ne.s32.totalorder %s1463_s17, %s1037_s2  ;;  %p1044_p1 = scmp.lt.u32.totalorder %s1042_s22, %s1037_s2 }
  0x5d   : > { %p1046_p10 = scmp.lt.u32.totalorder %s1037_s2, %s1463_s17 }
  0x5e   : > { %p1040_p11 = pnand %p1039_p0, %p1038_p7  ;;  %p1045_p3 = por %p1044_p1, %p1043_p2 }
  0x60   : > { %p1041_p9 = pneg %p1040_p11  ;;  %p1047_p8 = por %p1046_p10, %p1045_p3 }
  0x62   : > { %p1048_p6 = pnand %p1047_p8, %p1041_p9 }
  0x64   : > { %1051 = shalt.err (!%p1048_p6)
}
  0x65   : > { %s1052_s23 = scalar_lea.vmem %s1473_s28, 64  ;;  %s1227_s27 = smov [#allocation4]  }
  0x66   : > { %p1053_p7 = scmp.ne.s32.totalorder %s1473_s28, %s1052_s23  ;;  %s1057_s19 = sshll.u32 %s1227_s27, 4  ;;  %s1058_s19 = int_to_ptr.vmem [resolvable:$false] %s1057_s19 }
  0x67   : > { %s1059_s29 = scalar_lea.vmem %s1058_s19, 128  ;;  %p1060_p13 = scmp.lt.s32.totalorder %s1473_s28, %s1058_s19 }
  0x68   : > { %p1055_p11 = pnand %p1053_p7, %p1039_p0  ;;  %p1061_p2 = scmp.lt.s32.totalorder %s1059_s29, %s1052_s23 }
  0x6a   : > { %p1056_p4 = pneg %p1055_p11  ;;  %p1062_p1 = por %p1061_p2, %p1060_p13 }
  0x6c   : > { %p1063_p10 = pnand %p1062_p1, %p1056_p4 }
  0x6e   : > { %1066 = shalt.err (!%p1063_p10)
}
  0x6f   : > { %875 = dma.hbm_to_vmem [thread:$0]  (!%p1469_p5), %s1463_s17, 64, %s1473_s28, %s212_s14  }
  0x70   : > { %s115_s2 = sld [smem:[#allocation3 + %s1221_s15]]  ;;  %p127_p13 = scmp.ne.s32.totalorder %s1193_s9, %s1189_s8 }
  0x71   : > { %s116_s0 = sld [smem:[#allocation3 + %s1330_s16]]  ;;  %p133_p4 = scmp.ne.s32.totalorder %s1189_s8, %s1185_s7 }
  0x72   : > { %p1730_p6 = scmp.eq.s32.totalorder %s1221_s15, 0  ;;  %p1731_p0 = scmp.eq.s32.totalorder %s1383_s20, 0 }
  0x73   : > { %s261_s10 = sand.u32 1, %s1193_s9   ;;  %s120_s19 = sadd.s32 1, %s1193_s9 }
  0x74   : > { %p129_p8 = por %p127_p13, %p1730_p6  ;;  %p1510_p9 = por %p133_p4, %p1731_p0 }
  0x75   : > { %s770_s29 = sshll.u32 %s261_s10, 6  ;;  %p1734_p5 = scmp.lt.s32.totalorder %s1221_s15, 3 }
  0x76   : > { %s1732_s22 = scalar_select %p1510_p9, 1, 0 }
  0x77   : > { %s864_s23 = scalar_select %p129_p8, [#allocation3], [#allocation12] }
  0x78   : > { %s117_s27 = ssub.s32 %s115_s2, %s116_s0  ;;  %p1735_p7 = pmov %p1734_p5 }
  0x79   : > { %p118_p3 = scmp.eq.s32.totalorder %s117_s27, 0  ;;  %s1763_s23 = smov (!%p1734_p5, %s864_s23), [#allocation14] }
  0x7a   : > { %s865_s14 = scalar_select %p129_p8, %s1221_s15, 0 }
  0x7b   : > { %s1518_s28 = scalar_select %p118_p3, %s1193_s9, %s120_s19  }
  0x7c   : > { %s1765_s14 = smov (!%p1735_p7, %s865_s14), 0  ;;  %p1736_p11 = pmov %p1734_p5 }
  0x7d   : > { %1733 = sst [smem:[#allocation24_spill]] %s1518_s28  ;;  %s263_s1 = scalar_lea.vmem [#allocation9], %s770_s29 }
  0x7e   : > { %p1526_p2 = pnand %p1736_p11, %p129_p8  ;;  %s264_s17 = sld [smem:[%s1763_s23 + %s1765_s14]] }
  0x7f   : > { %s271_s2 = sshll.u32 %s263_s1, 4  ;;  %s1072_s29 = scalar_lea.hbm %s1696_s4, 3072  ;;  %s1530_s2 = int_to_ptr.vmem [resolvable:$true] %s271_s2 }
  0x80   : > { %p1069_p10 = pneg %p1526_p2 }
  0x84   : > { %s801_s0 = sshll.u32 %s264_s17, 10 }
  0x85   : > { %s1535_s19 = scalar_lea.hbm %s1696_s4, %s801_s0 }
  0x86   : > { %s1067_s28 = scalar_lea.hbm %s1535_s19, 1024  ;;  %p1073_p6 = scmp.lt.u32.totalorder %s1535_s19, %s1696_s4 }
  0x87   : > { %p1068_p1 = scmp.ne.s32.totalorder %s1535_s19, %s1067_s28  ;;  %p1074_p8 = scmp.lt.u32.totalorder %s1072_s29, %s1067_s28 }
  0x88   : > { %p1076_p3 = scmp.lt.u32.totalorder %s1067_s28, %s1535_s19 }
  0x89   : > { %p1070_p13 = pnand %p1069_p10, %p1068_p1  ;;  %p1075_p0 = por %p1074_p8, %p1073_p6 }
  0x8b   : > { %p1071_p4 = pneg %p1070_p13  ;;  %p1077_p5 = por %p1076_p3, %p1075_p0 }
  0x8d   : > { %p1078_p7 = pnand %p1077_p5, %p1071_p4 }
  0x8f   : > { %1081 = shalt.err (!%p1078_p7)
}
  0x90   : > { %s1082_s0 = scalar_lea.vmem %s1530_s2, 1024  ;;  %s1228_s10 = smov [#allocation9]  }
  0x91   : > { %p1083_p11 = scmp.ne.s32.totalorder %s1530_s2, %s1082_s0  ;;  %s1087_s27 = sshll.u32 %s1228_s10, 4  ;;  %s1088_s27 = int_to_ptr.vmem [resolvable:$false] %s1087_s27 }
  0x92   : > { %s1089_s1 = scalar_lea.vmem %s1088_s27, 2048  ;;  %p1090_p9 = scmp.lt.s32.totalorder %s1530_s2, %s1088_s27 }
  0x93   : > { %p1085_p1 = pnand %p1083_p11, %p1069_p10  ;;  %p1091_p6 = scmp.lt.s32.totalorder %s1089_s1, %s1082_s0 }
  0x95   : > { %p1086_p13 = pneg %p1085_p1  ;;  %p1092_p8 = por %p1091_p6, %p1090_p9 }
  0x97   : > { %p1093_p0 = pnand %p1092_p8, %p1086_p13 }
  0x99   : > { %1096 = shalt.err (!%p1093_p0)
}
  0x9a   : > { %s1738_s28 = smov 4   ;;  %s1739_s23 = smov 64  }
  0x9b   : > { %885 = dma.hbm_to_vmem [thread:$0]  (!%p1526_p2), %s1535_s19, 1024, %s1530_s2, %s1385_s25, %s1739_s23, %s1739_s23, %s1738_s28  }
  0x9c   : > { %291 = sbr.rel (%p1373_p12) target bundleno = 692 (0x2b4), region = 40  ;;  %s1569_s29 = sand.u32 (!%p1373_p12), 1, %s1213_s13  }
  0x9d   : > { %s774_s14 = sshll.u32 (!%p1373_p12), %s1569_s29, 2  ;;  %s294_s17 = scalar_lea.sflag (!%p1373_p12), [#allocation5], %s1569_s29 }
  0x9e   : > { %s1575_s7 = scalar_lea.vmem (!%p1373_p12), [#allocation4], %s774_s14  ;;  %p1740_p9 = scmp.ne.s32.totalorder (!%p1373_p12), %s1722_s26, 0 }
  0xa3   : > { %1168 = dma.done.wait (%p1740_p9), %s294_s17, 64  }
  0xa4   : > { %1170 = vsyncadd (%p1740_p9), %s294_s17, 4294967232  ;;  %s302_s18 = sand.u32 1, %s1383_s20   ;;  %s304_s25 = sand.u32 1, %s1201_s11  }
  0xa5   : > { %s775_s2 = sshll.u32 %s304_s25, 6  ;;  %s303_s19 = scalar_lea.sflag [#allocation8], %s302_s18 }
  0xa6   : > { %s1583_s0 = scalar_lea.vmem [#allocation7], %s775_s2  ;;  %p1741_p12 = scmp.ne.s32.totalorder %s1724_s30, 0 }
  0xa8   : > { %1172 = dma.done.wait (%p1741_p12), %s303_s19, 1024  }
  0xa9   : > { %1174 = vsyncadd (%p1741_p12), %s303_s19, 4294966272  ;;  %s313_s10 = sand.u32 1, %s1189_s8   ;;  %p1742_p2 = scmp.ne.s32.totalorder %s1732_s22, 0 }
  0xaa   : > { %s776_s27 = sshll.u32 %s313_s10, 6 }
  0xab   : > { %s1590_s26 = scalar_lea.vmem [#allocation9], %s776_s27 }
  0xac   : > { %1176 = dma.done.wait (%p1742_p2), %s303_s19, 1024  }
  0xad   : > { %1178 = vsyncadd (%p1742_p2), %s303_s19, 4294966272  ;;  %v1229_v0 = vmov 0.0   ;;  %vm1230_vm0 = vmmov 0   ;;  %v977_v1 = vld [vmem:[%s1583_s0] sm:$0xff]   ;;  %v978_v2 = vld [vmem:[%s1583_s0 + $0x8] sm:$0xff]   ;;  %s361_s30 = sld [smem:[#allocation3 + %s1383_s20]] }
  0xae   : > { %820 = vmatprep.subr.bf16.mxu0 %v1229_v0  ;;  %836 = vmatprep.mubr.msk.bf16.mxu0 %vm1230_vm0, %v1229_v0  ;;  %v979_v3 = vld [vmem:[%s1583_s0 + $0x10] sm:$0xff]   ;;  %v980_v4 = vld [vmem:[%s1583_s0 + $0x18] sm:$0xff]   ;;  %v981_v5 = vld [vmem:[%s1583_s0 + $0x20] sm:$0xff]   ;;  %s367_s23 = sld [smem:[#allocation3 + %s1383_s20]]  ;;  %s797_s25 = sshll.u32 %s1383_s20, 6 }
  0xaf   : > { %840 = vmatprep.subr.bf16.mxu1 %v1229_v0  ;;  %856 = vmatprep.mubr.msk.bf16.mxu1 %vm1230_vm0, %v1229_v0  ;;  %v982_v6 = vld [vmem:[%s1583_s0 + $0x28] sm:$0xff]   ;;  %v983_v7 = vld [vmem:[%s1583_s0 + $0x30] sm:$0xff]   ;;  %v984_v8 = vld [vmem:[%s1583_s0 + $0x38] sm:$0xff]   ;;  %s359_s2 = scalar_lea.vmem [#allocation10], %s774_s14  ;;  %s1631_s27 = scalar_lea.hbm %s1698_s6, %s797_s25 }
  0xb0   : > { %821 = vmatpush3.bf16.msra.mxu0 %v977_v1  ;;  %v1605_v9 = vld [vmem:[%s1575_s7] sm:$0xf]  ;;  %v985_v10 = vld [vmem:[%s1590_s26] sm:$0xff]   ;;  %v986_v11 = vld [vmem:[%s1590_s26 + $0x8] sm:$0xff]   ;;  %s631_s19 = sshll.u32 %s359_s2, 4  ;;  %p1743_p5 = scmp.ne.s32.totalorder %s1725_s24, 0  ;;  %s1633_s19 = int_to_ptr.vmem [resolvable:$true] %s631_s19 }
  0xb1   : > { %822 = vmatprep.subr.bf16.mxu0 %v1229_v0  ;;  %841 = vmatpush3.bf16.msra.mxu1 %v985_v10  ;;  %v987_v12 = vld [vmem:[%s1590_s26 + $0x10] sm:$0xff]   ;;  %v988_v13 = vld [vmem:[%s1590_s26 + $0x18] sm:$0xff]   ;;  %v989_v14 = vld [vmem:[%s1590_s26 + $0x20] sm:$0xff]   ;;  %v613_v41 = vunpack.c.l.bf16 %v1605_v9  ;;  %s1231_s20 = smov [#allocation10]  }
  0xb2   : > { %842 = vmatprep.subr.bf16.mxu1 %v1229_v0  ;;  %v990_v15 = vld [vmem:[%s1590_s26 + $0x28] sm:$0xff]   ;;  %v991_v16 = vld [vmem:[%s1590_s26 + $0x30] sm:$0xff]   ;;  %v992_v17 = vld [vmem:[%s1590_s26 + $0x38] sm:$0xff]   ;;  %s618_s26 = scalar_lea.sflag [#allocation6], %s1569_s29  ;;  %s1101_s14 = sshll.u32 %s1231_s20, 4  ;;  %s1102_s14 = int_to_ptr.vmem [resolvable:$false] %s1101_s14 }
  0xb3   : > { %p362_p10 = scmp.lt.s32.totalorder %s361_s30, 2  ;;  %s1103_s22 = scalar_lea.vmem %s1102_s14, 128 }
  0xb4   : > { %823 = vmatpush3.bf16.msra.mxu0 %v978_v2  ;;  %p368_p4 = scmp.lt.s32.totalorder %s367_s23, 2  ;;  %p1104_p1 = scmp.lt.s32.totalorder %s1633_s19, %s1102_s14 }
  0xb5   : > { %824 = vmatprep.subr.bf16.mxu0 %v1229_v0  ;;  %843 = vmatpush3.bf16.msra.mxu1 %v986_v11  ;;  %s1767_s30 = smov (!%p362_p10, %s361_s30), 2 }
  0xb6   : > { %844 = vmatprep.subr.bf16.mxu1 %v1229_v0  ;;  %s364_s28 = scalar_lea.vmem %s1695_s3, %s1767_s30  ;;  %s1769_s23 = smov (!%p368_p4, %s367_s23), 2 }
  0xb7   : > { %v778_v18 = vld [vmem:[%s364_s28] ss:$0 sm:$0xff]  ;;  %s370_s18 = scalar_lea.vmem %s1697_s5, %s1769_s23  ;;  %s1097_s30 = scalar_lea.vmem %s1633_s19, 64 }
  0xb8   : > { %825 = vmatpush3.bf16.msra.mxu0 %v979_v3  ;;  %v787_v40 = vld [vmem:[%s370_s18] ss:$0 sm:$0xff]  ;;  %p1098_p3 = scmp.ne.s32.totalorder %s1633_s19, %s1097_s30  ;;  %p1105_p13 = scmp.lt.s32.totalorder %s1103_s22, %s1097_s30 }
  0xb9   : > { %826 = vmatprep.subr.bf16.mxu0 %v1229_v0  ;;  %845 = vmatpush3.bf16.msra.mxu1 %v987_v12 }
  0xba   : > { %846 = vmatprep.subr.bf16.mxu1 %v1229_v0  ;;  %p1099_p7 = pnand %p1098_p3, %p1743_p5  ;;  %p1106_p6 = por %p1105_p13, %p1104_p1 }
  0xbc   : > { %827 = vmatpush3.bf16.msra.mxu0 %v980_v4  ;;  %p1100_p11 = pneg %p1099_p7 }
  0xbd   : > { %828 = vmatprep.subr.bf16.mxu0 %v1229_v0  ;;  %847 = vmatpush3.bf16.msra.mxu1 %v988_v13 }
  0xbe   : > { %848 = vmatprep.subr.bf16.mxu1 %v1229_v0  ;;  %p1107_p8 = pnand %p1106_p6, %p1100_p11 }
  0xc0   : > { %829 = vmatpush3.bf16.msra.mxu0 %v981_v5 }
  0xc1   : > { %830 = vmatprep.subr.bf16.mxu0 %v1229_v0  ;;  %849 = vmatpush3.bf16.msra.mxu1 %v989_v14 }
  0xc2   : > { %850 = vmatprep.subr.bf16.mxu1 %v1229_v0 }
  0xc4   : > { %831 = vmatpush3.bf16.msra.mxu0 %v982_v6 }
  0xc5   : > { %832 = vmatprep.subr.bf16.mxu0 %v1229_v0  ;;  %851 = vmatpush3.bf16.msra.mxu1 %v990_v15 }
  0xc6   : > { %852 = vmatprep.subr.bf16.mxu1 %v1229_v0 }
  0xc8   : > { %833 = vmatpush3.bf16.msra.mxu0 %v983_v7 }
  0xc9   : > { %834 = vmatprep.subr.bf16.mxu0 %v1229_v0  ;;  %853 = vmatpush3.bf16.msra.mxu1 %v991_v16 }
  0xca   : > { %854 = vmatprep.subr.bf16.mxu1 %v1229_v0 }
  0xcc   : > { %835 = vmatpush3.bf16.msra.mxu0 %v984_v8 }
  0xcd   : > { %855 = vmatpush3.bf16.msra.mxu1 %v992_v17 }
  0xcf   : > { %837 = vmatmul.mubr.bf16.vlgmr.msra.gmra.mrb[0].mxu0 %v1605_v9 }
 0x1a2   : > { %v479_v19 = vpop.f32.mrb[0].mxu0 }
 0x1a3   : > { %v480_v20 = vadd.f32 %v778_v18, %v479_v19  ;;  %v838_v21 = vpop.f32.mrb[1].mxu0 }
 0x1a4   : > { %v482_v22 = vpop.f32.mrb[2].mxu0 }
 0x1a5   : > { %v485_v23 = vand.u32 2147483647, %v480_v20  ;;  %v839_v24 = vpop.f32.mrb[3].mxu0  ;;  %vm489_vm1 = vcmp.ge.f32.partialorder %v480_v20, 0.0 }
 0x1a7   : > { %v486_v25 = vsub.f32 0.0, %v485_v23 }
 0x1a9   : > { %v487_v26 = vmul.f32 1.442695, %v486_v25 }
 0x1ab   : > { %993 = vpow2.f32 %v487_v26 }
 0x1b5   : > { %v994_v27 = vpop.eup %993 }
 0x1b6   : > { %v490_v28 = vmul.f32 2.0, %v994_v27  ;;  %v492_v29 = vmul.f32 %v994_v27, %v994_v27 }
 0x1b8   : > { %v491_v30 = vadd.f32 1.0, %v490_v28  ;;  %v493_v31 = vadd.f32 %v492_v29, %v490_v28  ;;  %v495_v32 = vmul.f32 %v994_v27, %v490_v28 }
 0x1ba   : > { %v494_v33 = vsel %vm489_vm1, %v491_v30, %v493_v31  ;;  %v496_v34 = vsel %vm489_vm1, %v495_v32, 2.0 }
 0x1bb   : > { %v497_v35 = vadd.f32 %v496_v34, %v494_v33  ;;  %v498_v36 = vmul.f32 %v494_v33, %v480_v20 }
 0x1bd   : > { %995 = vrcp.f32 %v497_v35 }
 0x1c7   : > { %v996_v37 = vpop.eup %995 }
 0x1c8   : > { %v500_v38 = vmul.f32 %v996_v37, %v498_v36 }
 0x1ca   : > { %v501_v39 = vpack.c.bf16 %v500_v38, %v500_v38 }
 0x1cc   : > { %857 = vmatmul.mubr.bf16.vlgmr.msra.gmra.mrb[0].mxu1 %v501_v39 }
 0x29f   : > { %v607_v42 = vpop.f32.mrb[0].mxu1 }
 0x2a0   : > { %v608_v43 = vadd.f32 %v787_v40, %v607_v42  ;;  %v858_v44 = vpop.f32.mrb[1].mxu1 }
 0x2a1   : > { %v610_v45 = vpop.f32.mrb[2].mxu1 }
 0x2a2   : > { %v614_v46 = vadd.f32 %v613_v41, %v608_v43  ;;  %v859_v47 = vpop.f32.mrb[3].mxu1 }
 0x2a4   : > { %v615_v48 = vpack.c.bf16 %v614_v46, %v614_v46 }
 0x2a6   : > { %616 = vst [vmem:[%s359_s2] sm:$0xf] %v615_v48 }
 0x2a7   : > { %1110 = shalt.err (!%p1107_p8)
}
 0x2a8   : > { %s1111_s29 = scalar_lea.hbm %s1631_s27, 64  ;;  %s1115_s23 = scalar_lea.hbm %s1698_s6, 192 }
 0x2a9   : > { %p1112_p0 = scmp.ne.s32.totalorder %s1631_s27, %s1111_s29  ;;  %p1116_p2 = scmp.lt.u32.totalorder %s1631_s27, %s1698_s6 }
 0x2aa   : > { %p1117_p10 = scmp.lt.u32.totalorder %s1115_s23, %s1111_s29  ;;  %p1119_p3 = scmp.lt.u32.totalorder %s1111_s29, %s1631_s27 }
 0x2ab   : > { %p1113_p9 = pnand %p1112_p0, %p1743_p5 }
 0x2ac   : > { %p1118_p4 = por %p1117_p10, %p1116_p2 }
 0x2ad   : > { %p1114_p12 = pneg %p1113_p9 }
 0x2ae   : > { %p1120_p7 = por %p1119_p3, %p1118_p4 }
 0x2b0   : > { %p1121_p11 = pnand %p1120_p7, %p1114_p12 }
 0x2b2   : > { %1124 = shalt.err (!%p1121_p11)
}
 0x2b3   : > { %870 = dma.vmem_to_hbm [thread:$0]  (%p1743_p5), %s1633_s19, 64, %s1631_s27, %s618_s26  }
 0x2b4 PF: > { %p891_p1 = scmp.ge.s32.totalorder %s1221_s15, 2  ;;  %s643_s18 = sand.u32 1, %s1209_s12  }
 0x2b5   : > { %p1744_p13 = scmp.ne.s32.totalorder %s1726_s21, 0  ;;  %s644_s25 = scalar_lea.sflag [#allocation6], %s643_s18 }
 0x2b7   : > { %p887_p6 = pnand %p891_p1, %p1744_p13 }
 0x2b9   : > { %1180 = dma.done.wait (!%p887_p6), %s644_s25, 64  }
 0x2ba   : > { %1182 = vsyncadd (!%p887_p6), %s644_s25, 4294967232  ;;  %s1745_s2 = sld [smem:[#allocation24_spill]]  ;;  %s1746_s24 = sld [smem:[#allocation20_spill]] }
 0x2bb   : > { %s1747_s0 = sld [smem:[#allocation22_spill]]  ;;  %s1748_s19 = sld [smem:[#allocation21_spill]] }
 0x2bc   : > { %s1749_s14 = sld [smem:[#allocation23_spill]]  ;;  %p26_p5 = scmp.ge.s32.totalorder %s1330_s16, 5  }
 0x2bd   : > { %s1750_s7 = smov %s1189_s8  ;;  %s1751_s8 = smov %s1193_s9 }
 0x2be   : > { %s1753_s10 = smov %s1201_s11  ;;  %s1755_s12 = smov %s1213_s13 }
 0x2bf   : > { %s1757_s15 = smov %s1330_s16  ;;  %28 = sbr.rel (!%p26_p5) target bundleno = 23 (0x17), region = 115 }
 0x2c0   : > { %s1752_s9 = smov %s1745_s2  ;;  %s1754_s11 = smov %s1746_s24 }
 0x2c1   : > { %s1756_s13 = smov %s1748_s19 }
 0x2c6   :  { %649 = vsyncpa [#allocation5], 1 }
 0x2c7   :  { %651 = vsyncpa [#allocation5 + $0x1], 1 }
 0x2c8   :  { %652 = vsyncpa [#allocation8], 1 }
 0x2c9   :  { %654 = vsyncpa [#allocation8 + $0x1], 1 }
 0x2ca   :  { %655 = vsyncpa [#allocation6], 1 }
 0x2cb   :  { %657 = vsyncpa [#allocation6 + $0x1], 1 }

</bundles_post_ra>
